<compile_context>
chip_gen: v6e
topology: v6e:2x2x1
jax: 0.10.0
libtpu: 0.0.40
codegen_flags: <defaults>
</compile_context>

<pallas_src>
import functools

import jax
import jax.numpy as jnp
from jax.experimental import pallas as pl
from jax.experimental.pallas import tpu as pltpu


# --------------------------------------------------------------------------- #
# Kernel
# --------------------------------------------------------------------------- #
def make_flow_kernel(num_hidden: int, approx_silu: bool):
    """num_hidden = num_layers - 1 (number of Linear(H,H)+SiLU blocks)."""

    def sigmoid(z):
        # Stable: the exponent is always <= 0, so exp never overflows.
        pos = z >= 0.0
        ez = jnp.exp(jnp.where(pos, -z, z))
        if approx_silu:
            r = pl.reciprocal(1.0 + ez, approx=True)   # EUP slot, ~free
        else:
            r = 1.0 / (1.0 + ez)
        return jnp.where(pos, r, ez * r)

    def silu(z):
        return z * sigmoid(z)

    def mm(w_ref, act):
        # (out, in) @ (in, TILE_B). Cast activations to the weight dtype (bf16
        # on the fast path) right at the MXU; always accumulate in f32.
        return jnp.dot(w_ref[...], act.astype(w_ref.dtype),
                       preferred_element_type=jnp.float32)

    def kernel(u_ref, w_e1_ref, b_e1_ref, w_e2_ref, b_e2_ref,
               w0x_ref, w0tc_ref, b0_ref, *rest):
        # rest = [w_h0, b_h0, ..., w_h{num_hidden-1}, b_h{num_hidden-1},
        #         w_out, b_out, out_ref]
        hidden_refs = rest[: 2 * num_hidden]
        w_out_ref = rest[2 * num_hidden]
        b_out_ref = rest[2 * num_hidden + 1]
        out_ref = rest[2 * num_hidden + 2]

        u = u_ref[...]                              # (F, TILE_B), rows [t|y|x|0]

        # ---- first layers of time_embed and cond_embed fused into one
        # (2H, F) MXU pass (K = 8, sublane-aligned).
        a = silu(mm(w_e1_ref, u) + b_e1_ref[...])   # (2H, TILE_B)

        # ---- second layers of both embeds as a block-diagonal (2H, 2H) pass:
        # emb rows = [t_embed ; cond_embed].
        emb = mm(w_e2_ref, a) + b_e2_ref[...]       # (2H, TILE_B)

        # ---- net[0]: concat([x, te, ce]) @ W0 expressed as two dots.
        h = silu(mm(w0tc_ref, emb) + mm(w0x_ref, u) + b0_ref[...])   # (H, TILE_B)

        # ---- hidden Linear(H,H)+SiLU blocks.
        for l in range(num_hidden):
            h = silu(mm(hidden_refs[2 * l], h) + hidden_refs[2 * l + 1][...])

        # ---- final projection: (D, TILE_B), lane-dense store, no dead columns.
        out = mm(w_out_ref, h) + b_out_ref[...]
        out_ref[...] = out.astype(out_ref.dtype)

    return kernel


# --------------------------------------------------------------------------- #
# Parameters
# --------------------------------------------------------------------------- #
def init_params(key, input_dim, hidden_dim, num_layers):
    """Deterministic synthetic parameters. Weights are (in, out) (y = x @ W + b)."""
    def lin(k, fan_in, fan_out):
        kw, kb = jax.random.split(k)
        s = 1.0 / jnp.sqrt(jnp.float32(fan_in))
        w = jax.random.uniform(kw, (fan_in, fan_out), jnp.float32, -s, s)
        b = jax.random.uniform(kb, (1, fan_out), jnp.float32, -s, s)
        return w, b

    n_hidden = num_layers - 1
    keys = jax.random.split(key, 6 + n_hidden)
    p = {}
    p["wt1"], p["bt1"] = lin(keys[0], 1, hidden_dim)
    p["wt2"], p["bt2"] = lin(keys[1], hidden_dim, hidden_dim)
    p["wc1"], p["bc1"] = lin(keys[2], 2, hidden_dim)
    p["wc2"], p["bc2"] = lin(keys[3], hidden_dim, hidden_dim)
    p["wn0"], p["bn0"] = lin(keys[4], input_dim + 2 * hidden_dim, hidden_dim)
    p["hidden"] = [lin(keys[5 + l], hidden_dim, hidden_dim) for l in range(n_hidden)]
    p["wout"], p["bout"] = lin(keys[5 + n_hidden], hidden_dim, input_dim)
    return p


def fuse_params(p):
    """Build kernel-ready fused weights once, in the (out, in) transposed
    orientation, plus a precomputed bf16 copy for the fast path."""
    H = p["wt2"].shape[0]
    D = p["wout"].shape[1]
    F = max(8, ((3 + D + 7) // 8) * 8)      # padded feature rows of streamed input

    # Fused first embed layer: rows [:H] = time pre-act, rows [H:] = cond pre-act.
    # Streamed-input feature order (rows of u): [t, y0, y1, x0..x_{D-1}, 0...].
    w_e1 = jnp.zeros((2 * H, F), jnp.float32)
    w_e1 = w_e1.at[:H, 0].set(p["wt1"][0, :])
    w_e1 = w_e1.at[H:, 1:3].set(p["wc1"].T)
    b_e1 = jnp.concatenate([p["bt1"], p["bc1"]], axis=1).T          # (2H, 1)

    # Block-diagonal second embed layer: diag(wt2ᵀ, wc2ᵀ).
    w_e2 = jnp.zeros((2 * H, 2 * H), jnp.float32)
    w_e2 = w_e2.at[:H, :H].set(p["wt2"].T)
    w_e2 = w_e2.at[H:, H:].set(p["wc2"].T)
    b_e2 = jnp.concatenate([p["bt2"], p["bc2"]], axis=1).T          # (2H, 1)

    # net[0] split: x rows (taken from the streamed u) and [te|ce] rows.
    w0 = p["wn0"]                                                   # (D + 2H, H)
    w0x = jnp.zeros((H, F), jnp.float32).at[:, 3:3 + D].set(w0[:D].T)
    w0tc = w0[D:].T                                                 # (H, 2H)
    b0 = p["bn0"].T                                                 # (H, 1)

    hidden = [(w.T, b.T) for (w, b) in p["hidden"]]                 # (H,H), (H,1)
    w_out = p["wout"].T                                             # (D, H)
    b_out = p["bout"].T                                             # (D, 1)

    f32 = dict(w_e1=w_e1, b_e1=b_e1, w_e2=w_e2, b_e2=b_e2,
               w0x=w0x, w0tc=w0tc, b0=b0, hidden=hidden,
               w_out=w_out, b_out=b_out)

    # bf16 MXU copies precomputed once (biases stay f32; elementwise math is f32).
    bf16 = dict(f32)
    for k in ("w_e1", "w_e2", "w0x", "w0tc", "w_out"):
        bf16[k] = f32[k].astype(jnp.bfloat16)
    bf16["hidden"] = [(w.astype(jnp.bfloat16), b) for (w, b) in hidden]
    return {"f32": f32, "bf16": bf16}


# --------------------------------------------------------------------------- #
# Forward wrapper
# --------------------------------------------------------------------------- #
@functools.partial(jax.jit, static_argnames=("tile_b_max", "fast_math"))
def flow_model_forward(t, x, y, fused, *, tile_b_max=1024, fast_math=True):
    B, D = x.shape
    w = fused["bf16"] if fast_math else fused["f32"]
    F = w["w_e1"].shape[1]
    num_hidden = len(w["hidden"])

    # ---- pick a batch tile: lane multiple, and an EVEN grid of >= 2 steps so
    # the batch splits evenly across the two v7x TensorCores.
    tile_b = min(max(128, tile_b_max), pl.cdiv(pl.cdiv(B, 2), 128) * 128)
    tile_b = max(tile_b, 128)
    n_tiles = pl.cdiv(B, tile_b)
    if n_tiles % 2:
        n_tiles += 1
    b_pad = n_tiles * tile_b

    # ---- pack the streamed operand transposed (batch on lanes), feature rows
    # padded to F (multiple of 8): dense DMA tiles of shape (F, tile_b).
    u = jnp.concatenate([t.reshape(1, B).astype(jnp.float32),
                         y.astype(jnp.float32).T,
                         x.astype(jnp.float32).T], axis=0)          # (3+D, B)
    u = jnp.pad(u, ((0, F - (3 + D)), (0, b_pad - B)))              # (F, b_pad)

    inputs = [u, w["w_e1"], w["b_e1"], w["w_e2"], w["b_e2"],
              w["w0x"], w["w0tc"], w["b0"]]
    for (wh, bh) in w["hidden"]:
        inputs += [wh, bh]
    inputs += [w["w_out"], w["b_out"]]

    resident = lambda i: (0, 0)   # constant index_map -> weight stays in VMEM
    in_specs = [pl.BlockSpec((F, tile_b), lambda i: (0, i))]
    in_specs += [pl.BlockSpec(a.shape, resident) for a in inputs[1:]]

    out = pl.pallas_call(
        make_flow_kernel(num_hidden, approx_silu=fast_math),
        out_shape=jax.ShapeDtypeStruct((D, b_pad), jnp.float32),
        grid_spec=pltpu.PrefetchScalarGridSpec(
            num_scalar_prefetch=0,
            grid=(n_tiles,),
            in_specs=in_specs,
            out_specs=pl.BlockSpec((D, tile_b), lambda i: (0, i)),
        ),
        compiler_params=pltpu.CompilerParams(
            dimension_semantics=("parallel",),          # megacore on v7x
            vmem_limit_bytes=32 * 1024 * 1024,          # far above actual use
        ),
    )(*inputs)
    # Drop batch padding and return in the original (B, D) orientation.
    return out[:, :B].T


# --------------------------------------------------------------------------- #
# Plain-JAX reference (mirrors the PyTorch forward)
# --------------------------------------------------------------------------- #
def flow_model_reference(t, x, y, p):
    silu = lambda z: z * jax.nn.sigmoid(z)
    te = silu(t.reshape(-1, 1) @ p["wt1"] + p["bt1"]) @ p["wt2"] + p["bt2"]
    ce = silu(y @ p["wc1"] + p["bc1"]) @ p["wc2"] + p["bc2"]
    h = silu(jnp.concatenate([x, te, ce], axis=1) @ p["wn0"] + p["bn0"])
    for (w, b) in p["hidden"]:
        h = silu(h @ w + b)
    return h @ p["wout"] + p["bout"]


# --------------------------------------------------------------------------- #
if __name__ == "__main__":
    INPUT_DIM = 2
    HIDDEN_DIM = 32
    NUM_LAYERS = 3
    BATCH = 300          # not a tile multiple -> exercises padding + even grid

    key = jax.random.PRNGKey(0)
    kp, kt, kx, ky = jax.random.split(key, 4)
    params = init_params(kp, INPUT_DIM, HIDDEN_DIM, NUM_LAYERS)
    fused = fuse_params(params)

    t = jax.random.uniform(kt, (BATCH,), jnp.float32)            # time in [0,1)
    x = jax.random.normal(kx, (BATCH, INPUT_DIM), jnp.float32)   # state
    y = jax.random.normal(ky, (BATCH, 2), jnp.float32)           # condition

    ref = flow_model_reference(t, x, y, params)

    # Exact path: f32 MXU, exact (stable) sigmoid; small tile -> 4-step grid.
    out = flow_model_forward(t, x, y, fused, tile_b_max=128, fast_math=False)
    out = jax.block_until_ready(out)
    assert out.shape == (BATCH, INPUT_DIM)
    assert jnp.allclose(out, ref, atol=1e-3, rtol=1e-3), "mismatch vs reference (f32)"

    # Fast path (default): bf16 MXU + EUP approx reciprocal, big tiles, even grid.
    out_fast = flow_model_forward(t, x, y, fused, tile_b_max=1024, fast_math=True)
    out_fast = jax.block_until_ready(out_fast)
    assert out_fast.shape == (BATCH, INPUT_DIM)
    assert jnp.allclose(out_fast, ref, atol=5e-2, rtol=5e-2), "mismatch vs reference (bf16)"

    print("KERNEL_OK")
</pallas_src>

<mosaic_0001>
module attributes {stable_mosaic.version = 11 : i64} {
  func.func @kernel(%arg0: i32, %arg1: memref<8x128xf32, #tpu.memory_space<vmem>>, %arg2: memref<64x8xf32, #tpu.memory_space<vmem>>, %arg3: memref<64x1xf32, #tpu.memory_space<vmem>>, %arg4: memref<64x64xf32, #tpu.memory_space<vmem>>, %arg5: memref<64x1xf32, #tpu.memory_space<vmem>>, %arg6: memref<32x8xf32, #tpu.memory_space<vmem>>, %arg7: memref<32x64xf32, #tpu.memory_space<vmem>>, %arg8: memref<32x1xf32, #tpu.memory_space<vmem>>, %arg9: memref<32x32xf32, #tpu.memory_space<vmem>>, %arg10: memref<32x1xf32, #tpu.memory_space<vmem>>, %arg11: memref<32x32xf32, #tpu.memory_space<vmem>>, %arg12: memref<32x1xf32, #tpu.memory_space<vmem>>, %arg13: memref<2x32xf32, #tpu.memory_space<vmem>>, %arg14: memref<2x1xf32, #tpu.memory_space<vmem>>, %arg15: memref<2x128xf32, #tpu.memory_space<vmem>>) attributes {dimension_semantics = [#tpu.dimension_semantics<parallel>], iteration_bounds = array<i64: 4>, scalar_prefetch = 0 : i64, scratch_operands = 0 : i64, tpu.core_type = #tpu.core_type<tc>, window_params = [{transform_indices = @transform_0, window_bounds = array<i64: 8, 128>}, {pipeline_mode = #tpu.pipeline_mode<synchronous>, transform_indices = @transform_1, window_bounds = array<i64: 64, 8>}, {pipeline_mode = #tpu.pipeline_mode<synchronous>, transform_indices = @transform_2, window_bounds = array<i64: 64, 1>}, {pipeline_mode = #tpu.pipeline_mode<synchronous>, transform_indices = @transform_3, window_bounds = array<i64: 64, 64>}, {pipeline_mode = #tpu.pipeline_mode<synchronous>, transform_indices = @transform_4, window_bounds = array<i64: 64, 1>}, {pipeline_mode = #tpu.pipeline_mode<synchronous>, transform_indices = @transform_5, window_bounds = array<i64: 32, 8>}, {pipeline_mode = #tpu.pipeline_mode<synchronous>, transform_indices = @transform_6, window_bounds = array<i64: 32, 64>}, {pipeline_mode = #tpu.pipeline_mode<synchronous>, transform_indices = @transform_7, window_bounds = array<i64: 32, 1>}, {pipeline_mode = #tpu.pipeline_mode<synchronous>, transform_indices = @transform_8, window_bounds = array<i64: 32, 32>}, {pipeline_mode = #tpu.pipeline_mode<synchronous>, transform_indices = @transform_9, window_bounds = array<i64: 32, 1>}, {pipeline_mode = #tpu.pipeline_mode<synchronous>, transform_indices = @transform_10, window_bounds = array<i64: 32, 32>}, {pipeline_mode = #tpu.pipeline_mode<synchronous>, transform_indices = @transform_11, window_bounds = array<i64: 32, 1>}, {pipeline_mode = #tpu.pipeline_mode<synchronous>, transform_indices = @transform_12, window_bounds = array<i64: 2, 32>}, {pipeline_mode = #tpu.pipeline_mode<synchronous>, transform_indices = @transform_13, window_bounds = array<i64: 2, 1>}, {transform_indices = @transform_14, window_bounds = array<i64: 2, 128>}]} {
    %c0 = arith.constant 0 : index
    %c0_0 = arith.constant 0 : index
    %0 = vector.load %arg1[%c0, %c0_0] : memref<8x128xf32, #tpu.memory_space<vmem>>, vector<8x128xf32>
    %c0_1 = arith.constant 0 : index
    %c0_2 = arith.constant 0 : index
    %1 = vector.load %arg2[%c0_1, %c0_2] : memref<64x8xf32, #tpu.memory_space<vmem>>, vector<64x8xf32>
    %cst = arith.constant dense<0.000000e+00> : vector<64x128xf32>
    %2 = tpu.matmul %1, %0, %cst {dimension_numbers = #tpu.dot_dimension_numbers<[1], [0], [0], [1], [0, 0, 1, 1], [], []>} : vector<64x8xf32>, vector<8x128xf32>, vector<64x128xf32> -> vector<64x128xf32>
    %c0_3 = arith.constant 0 : index
    %c0_4 = arith.constant 0 : index
    %3 = vector.load %arg3[%c0_3, %c0_4] : memref<64x1xf32, #tpu.memory_space<vmem>>, vector<64x1xf32>
    %4 = vector.broadcast %3 : vector<64x1xf32> to vector<64x128xf32>
    %5 = arith.addf %2, %4 : vector<64x128xf32>
    %cst_5 = arith.constant 0.000000e+00 : f32
    %6 = vector.broadcast %cst_5 : f32 to vector<64x128xf32>
    %7 = arith.cmpf oge, %5, %6 : vector<64x128xf32>
    %cst_6 = arith.constant 0.000000e+00 : f32
    %8 = vector.broadcast %cst_6 : f32 to vector<64x128xf32>
    %9 = arith.subf %8, %5 : vector<64x128xf32>
    %10 = arith.select %7, %9, %5 : vector<64x128xi1>, vector<64x128xf32>
    %11 = math.exp %10 : vector<64x128xf32>
    %cst_7 = arith.constant 1.000000e+00 : f32
    %12 = vector.broadcast %cst_7 : f32 to vector<64x128xf32>
    %13 = arith.addf %12, %11 : vector<64x128xf32>
    %cst_8 = arith.constant 1.000000e+00 : f32
    %14 = vector.broadcast %cst_8 : f32 to vector<64x128xf32>
    %15 = arith.divf %14, %13 : vector<64x128xf32>
    %16 = arith.mulf %11, %15 : vector<64x128xf32>
    %17 = arith.select %7, %15, %16 : vector<64x128xi1>, vector<64x128xf32>
    %18 = arith.mulf %5, %17 : vector<64x128xf32>
    %c0_9 = arith.constant 0 : index
    %c0_10 = arith.constant 0 : index
    %19 = vector.load %arg4[%c0_9, %c0_10] : memref<64x64xf32, #tpu.memory_space<vmem>>, vector<64x64xf32>
    %cst_11 = arith.constant dense<0.000000e+00> : vector<64x128xf32>
    %20 = tpu.matmul %19, %18, %cst_11 {dimension_numbers = #tpu.dot_dimension_numbers<[1], [0], [0], [1], [0, 0, 1, 1], [], []>} : vector<64x64xf32>, vector<64x128xf32>, vector<64x128xf32> -> vector<64x128xf32>
    %c0_12 = arith.constant 0 : index
    %c0_13 = arith.constant 0 : index
    %21 = vector.load %arg5[%c0_12, %c0_13] : memref<64x1xf32, #tpu.memory_space<vmem>>, vector<64x1xf32>
    %22 = vector.broadcast %21 : vector<64x1xf32> to vector<64x128xf32>
    %23 = arith.addf %20, %22 : vector<64x128xf32>
    %c0_14 = arith.constant 0 : index
    %c0_15 = arith.constant 0 : index
    %24 = vector.load %arg7[%c0_14, %c0_15] : memref<32x64xf32, #tpu.memory_space<vmem>>, vector<32x64xf32>
    %cst_16 = arith.constant dense<0.000000e+00> : vector<32x128xf32>
    %25 = tpu.matmul %24, %23, %cst_16 {dimension_numbers = #tpu.dot_dimension_numbers<[1], [0], [0], [1], [0, 0, 1, 1], [], []>} : vector<32x64xf32>, vector<64x128xf32>, vector<32x128xf32> -> vector<32x128xf32>
    %c0_17 = arith.constant 0 : index
    %c0_18 = arith.constant 0 : index
    %26 = vector.load %arg6[%c0_17, %c0_18] : memref<32x8xf32, #tpu.memory_space<vmem>>, vector<32x8xf32>
    %cst_19 = arith.constant dense<0.000000e+00> : vector<32x128xf32>
    %27 = tpu.matmul %26, %0, %cst_19 {dimension_numbers = #tpu.dot_dimension_numbers<[1], [0], [0], [1], [0, 0, 1, 1], [], []>} : vector<32x8xf32>, vector<8x128xf32>, vector<32x128xf32> -> vector<32x128xf32>
    %28 = arith.addf %25, %27 : vector<32x128xf32>
    %c0_20 = arith.constant 0 : index
    %c0_21 = arith.constant 0 : index
    %29 = vector.load %arg8[%c0_20, %c0_21] : memref<32x1xf32, #tpu.memory_space<vmem>>, vector<32x1xf32>
    %30 = vector.broadcast %29 : vector<32x1xf32> to vector<32x128xf32>
    %31 = arith.addf %28, %30 : vector<32x128xf32>
    %cst_22 = arith.constant 0.000000e+00 : f32
    %32 = vector.broadcast %cst_22 : f32 to vector<32x128xf32>
    %33 = arith.cmpf oge, %31, %32 : vector<32x128xf32>
    %cst_23 = arith.constant 0.000000e+00 : f32
    %34 = vector.broadcast %cst_23 : f32 to vector<32x128xf32>
    %35 = arith.subf %34, %31 : vector<32x128xf32>
    %36 = arith.select %33, %35, %31 : vector<32x128xi1>, vector<32x128xf32>
    %37 = math.exp %36 : vector<32x128xf32>
    %cst_24 = arith.constant 1.000000e+00 : f32
    %38 = vector.broadcast %cst_24 : f32 to vector<32x128xf32>
    %39 = arith.addf %38, %37 : vector<32x128xf32>
    %cst_25 = arith.constant 1.000000e+00 : f32
    %40 = vector.broadcast %cst_25 : f32 to vector<32x128xf32>
    %41 = arith.divf %40, %39 : vector<32x128xf32>
    %42 = arith.mulf %37, %41 : vector<32x128xf32>
    %43 = arith.select %33, %41, %42 : vector<32x128xi1>, vector<32x128xf32>
    %44 = arith.mulf %31, %43 : vector<32x128xf32>
    %c0_26 = arith.constant 0 : index
    %c0_27 = arith.constant 0 : index
    %45 = vector.load %arg9[%c0_26, %c0_27] : memref<32x32xf32, #tpu.memory_space<vmem>>, vector<32x32xf32>
    %cst_28 = arith.constant dense<0.000000e+00> : vector<32x128xf32>
    %46 = tpu.matmul %45, %44, %cst_28 {dimension_numbers = #tpu.dot_dimension_numbers<[1], [0], [0], [1], [0, 0, 1, 1], [], []>} : vector<32x32xf32>, vector<32x128xf32>, vector<32x128xf32> -> vector<32x128xf32>
    %c0_29 = arith.constant 0 : index
    %c0_30 = arith.constant 0 : index
    %47 = vector.load %arg10[%c0_29, %c0_30] : memref<32x1xf32, #tpu.memory_space<vmem>>, vector<32x1xf32>
    %48 = vector.broadcast %47 : vector<32x1xf32> to vector<32x128xf32>
    %49 = arith.addf %46, %48 : vector<32x128xf32>
    %cst_31 = arith.constant 0.000000e+00 : f32
    %50 = vector.broadcast %cst_31 : f32 to vector<32x128xf32>
    %51 = arith.cmpf oge, %49, %50 : vector<32x128xf32>
    %cst_32 = arith.constant 0.000000e+00 : f32
    %52 = vector.broadcast %cst_32 : f32 to vector<32x128xf32>
    %53 = arith.subf %52, %49 : vector<32x128xf32>
    %54 = arith.select %51, %53, %49 : vector<32x128xi1>, vector<32x128xf32>
    %55 = math.exp %54 : vector<32x128xf32>
    %cst_33 = arith.constant 1.000000e+00 : f32
    %56 = vector.broadcast %cst_33 : f32 to vector<32x128xf32>
    %57 = arith.addf %56, %55 : vector<32x128xf32>
    %cst_34 = arith.constant 1.000000e+00 : f32
    %58 = vector.broadcast %cst_34 : f32 to vector<32x128xf32>
    %59 = arith.divf %58, %57 : vector<32x128xf32>
    %60 = arith.mulf %55, %59 : vector<32x128xf32>
    %61 = arith.select %51, %59, %60 : vector<32x128xi1>, vector<32x128xf32>
    %62 = arith.mulf %49, %61 : vector<32x128xf32>
    %c0_35 = arith.constant 0 : index
    %c0_36 = arith.constant 0 : index
    %63 = vector.load %arg11[%c0_35, %c0_36] : memref<32x32xf32, #tpu.memory_space<vmem>>, vector<32x32xf32>
    %cst_37 = arith.constant dense<0.000000e+00> : vector<32x128xf32>
    %64 = tpu.matmul %63, %62, %cst_37 {dimension_numbers = #tpu.dot_dimension_numbers<[1], [0], [0], [1], [0, 0, 1, 1], [], []>} : vector<32x32xf32>, vector<32x128xf32>, vector<32x128xf32> -> vector<32x128xf32>
    %c0_38 = arith.constant 0 : index
    %c0_39 = arith.constant 0 : index
    %65 = vector.load %arg12[%c0_38, %c0_39] : memref<32x1xf32, #tpu.memory_space<vmem>>, vector<32x1xf32>
    %66 = vector.broadcast %65 : vector<32x1xf32> to vector<32x128xf32>
    %67 = arith.addf %64, %66 : vector<32x128xf32>
    %cst_40 = arith.constant 0.000000e+00 : f32
    %68 = vector.broadcast %cst_40 : f32 to vector<32x128xf32>
    %69 = arith.cmpf oge, %67, %68 : vector<32x128xf32>
    %cst_41 = arith.constant 0.000000e+00 : f32
    %70 = vector.broadcast %cst_41 : f32 to vector<32x128xf32>
    %71 = arith.subf %70, %67 : vector<32x128xf32>
    %72 = arith.select %69, %71, %67 : vector<32x128xi1>, vector<32x128xf32>
    %73 = math.exp %72 : vector<32x128xf32>
    %cst_42 = arith.constant 1.000000e+00 : f32
    %74 = vector.broadcast %cst_42 : f32 to vector<32x128xf32>
    %75 = arith.addf %74, %73 : vector<32x128xf32>
    %cst_43 = arith.constant 1.000000e+00 : f32
    %76 = vector.broadcast %cst_43 : f32 to vector<32x128xf32>
    %77 = arith.divf %76, %75 : vector<32x128xf32>
    %78 = arith.mulf %73, %77 : vector<32x128xf32>
    %79 = arith.select %69, %77, %78 : vector<32x128xi1>, vector<32x128xf32>
    %80 = arith.mulf %67, %79 : vector<32x128xf32>
    %c0_44 = arith.constant 0 : index
    %c0_45 = arith.constant 0 : index
    %81 = vector.load %arg13[%c0_44, %c0_45] : memref<2x32xf32, #tpu.memory_space<vmem>>, vector<2x32xf32>
    %cst_46 = arith.constant dense<0.000000e+00> : vector<2x128xf32>
    %82 = tpu.matmul %81, %80, %cst_46 {dimension_numbers = #tpu.dot_dimension_numbers<[1], [0], [0], [1], [0, 0, 1, 1], [], []>} : vector<2x32xf32>, vector<32x128xf32>, vector<2x128xf32> -> vector<2x128xf32>
    %c0_47 = arith.constant 0 : index
    %c0_48 = arith.constant 0 : index
    %83 = vector.load %arg14[%c0_47, %c0_48] : memref<2x1xf32, #tpu.memory_space<vmem>>, vector<2x1xf32>
    %84 = vector.broadcast %83 : vector<2x1xf32> to vector<2x128xf32>
    %85 = arith.addf %82, %84 : vector<2x128xf32>
    %c0_49 = arith.constant 0 : index
    %c0_50 = arith.constant 0 : index
    %86 = vector.load %arg15[%c0_49, %c0_50] : memref<2x128xf32, #tpu.memory_space<vmem>>, vector<2x128xf32>
    tpu.vector_store %arg15[%c0_49, %c0_50], %85 {strides = array<i32>} : memref<2x128xf32, #tpu.memory_space<vmem>>, vector<2x128xf32>,
    return
  }
  func.func @transform_0(%arg0: i32) -> (i32, i32) {
    %c0_i32 = arith.constant 0 : i32
    %c0_i32_0 = arith.constant 0 : i32
    return %c0_i32, %arg0 : i32, i32
  }
  func.func @transform_1(%arg0: i32) -> (i32, i32) {
    %c0_i32 = arith.constant 0 : i32
    %c0_i32_0 = arith.constant 0 : i32
    %c0_i32_1 = arith.constant 0 : i32
    return %c0_i32, %c0_i32_0 : i32, i32
  }
  func.func @transform_2(%arg0: i32) -> (i32, i32) {
    %c0_i32 = arith.constant 0 : i32
    %c0_i32_0 = arith.constant 0 : i32
    %c0_i32_1 = arith.constant 0 : i32
    return %c0_i32, %c0_i32_0 : i32, i32
  }
  func.func @transform_3(%arg0: i32) -> (i32, i32) {
    %c0_i32 = arith.constant 0 : i32
    %c0_i32_0 = arith.constant 0 : i32
    %c0_i32_1 = arith.constant 0 : i32
    return %c0_i32, %c0_i32_0 : i32, i32
  }
  func.func @transform_4(%arg0: i32) -> (i32, i32) {
    %c0_i32 = arith.constant 0 : i32
    %c0_i32_0 = arith.constant 0 : i32
    %c0_i32_1 = arith.constant 0 : i32
    return %c0_i32, %c0_i32_0 : i32, i32
  }
  func.func @transform_5(%arg0: i32) -> (i32, i32) {
    %c0_i32 = arith.constant 0 : i32
    %c0_i32_0 = arith.constant 0 : i32
    %c0_i32_1 = arith.constant 0 : i32
    return %c0_i32, %c0_i32_0 : i32, i32
  }
  func.func @transform_6(%arg0: i32) -> (i32, i32) {
    %c0_i32 = arith.constant 0 : i32
    %c0_i32_0 = arith.constant 0 : i32
    %c0_i32_1 = arith.constant 0 : i32
    return %c0_i32, %c0_i32_0 : i32, i32
  }
  func.func @transform_7(%arg0: i32) -> (i32, i32) {
    %c0_i32 = arith.constant 0 : i32
    %c0_i32_0 = arith.constant 0 : i32
    %c0_i32_1 = arith.constant 0 : i32
    return %c0_i32, %c0_i32_0 : i32, i32
  }
  func.func @transform_8(%arg0: i32) -> (i32, i32) {
    %c0_i32 = arith.constant 0 : i32
    %c0_i32_0 = arith.constant 0 : i32
    %c0_i32_1 = arith.constant 0 : i32
    return %c0_i32, %c0_i32_0 : i32, i32
  }
  func.func @transform_9(%arg0: i32) -> (i32, i32) {
    %c0_i32 = arith.constant 0 : i32
    %c0_i32_0 = arith.constant 0 : i32
    %c0_i32_1 = arith.constant 0 : i32
    return %c0_i32, %c0_i32_0 : i32, i32
  }
  func.func @transform_10(%arg0: i32) -> (i32, i32) {
    %c0_i32 = arith.constant 0 : i32
    %c0_i32_0 = arith.constant 0 : i32
    %c0_i32_1 = arith.constant 0 : i32
    return %c0_i32, %c0_i32_0 : i32, i32
  }
  func.func @transform_11(%arg0: i32) -> (i32, i32) {
    %c0_i32 = arith.constant 0 : i32
    %c0_i32_0 = arith.constant 0 : i32
    %c0_i32_1 = arith.constant 0 : i32
    return %c0_i32, %c0_i32_0 : i32, i32
  }
  func.func @transform_12(%arg0: i32) -> (i32, i32) {
    %c0_i32 = arith.constant 0 : i32
    %c0_i32_0 = arith.constant 0 : i32
    %c0_i32_1 = arith.constant 0 : i32
    return %c0_i32, %c0_i32_0 : i32, i32
  }
  func.func @transform_13(%arg0: i32) -> (i32, i32) {
    %c0_i32 = arith.constant 0 : i32
    %c0_i32_0 = arith.constant 0 : i32
    %c0_i32_1 = arith.constant 0 : i32
    return %c0_i32, %c0_i32_0 : i32, i32
  }
  func.func @transform_14(%arg0: i32) -> (i32, i32) {
    %c0_i32 = arith.constant 0 : i32
    %c0_i32_0 = arith.constant 0 : i32
    return %c0_i32, %arg0 : i32, i32
  }
}

</mosaic_0001>

<bundles_post_ra>
// kernel: flow_model_forward.1
= control target key start
LH: loop header
LB: loop body
LE: loop exit
PB: predicated region body
PF: predicated region fallthrough
CT: control target
= control target key end

     0   :  { %s2066_s29 = smov 0   ;;  %s2407_s0 = inlined_call_operand.vmem [shape: f32[8,512], index: 0, kind: input, shape index: {}]   ;;  %s2408_s1 = inlined_call_operand.vmem [shape: f32[64,8], index: 1, kind: input, shape index: {}]   ;;  %s2409_s2 = inlined_call_operand.vmem [shape: f32[64,1], index: 2, kind: input, shape index: {}]   ;;  %s2410_s3 = inlined_call_operand.vmem [shape: f32[64,64], index: 3, kind: input, shape index: {}]   ;;  %s2411_s4 = inlined_call_operand.vmem [shape: f32[64,1], index: 4, kind: input, shape index: {}]   ;;  %s2412_s5 = inlined_call_operand.vmem [shape: f32[32,8], index: 5, kind: input, shape index: {}]   ;;  %s2413_s6 = inlined_call_operand.vmem [shape: f32[32,64], index: 6, kind: input, shape index: {}]   ;;  %s2414_s7 = inlined_call_operand.vmem [shape: f32[32,1], index: 7, kind: input, shape index: {}]   ;;  %s2415_s8 = inlined_call_operand.vmem [shape: f32[32,32], index: 8, kind: input, shape index: {}]   ;;  %s2416_s9 = inlined_call_operand.vmem [shape: f32[32,1], index: 9, kind: input, shape index: {}]   ;;  %s2417_s10 = inlined_call_operand.vmem [shape: f32[32,32], index: 10, kind: input, shape index: {}]   ;;  %s2418_s11 = inlined_call_operand.vmem [shape: f32[32,1], index: 11, kind: input, shape index: {}]   ;;  %s2419_s12 = inlined_call_operand.vmem [shape: f32[2,32], index: 12, kind: input, shape index: {}]   ;;  %s2420_s13 = inlined_call_operand.vmem [shape: f32[2,1], index: 13, kind: input, shape index: {}]   ;;  %s2421_s14 = inlined_call_operand.vmem [shape: f32[2,512], index: 14, kind: output, shape index: {}]  }
   0x1 LB: > { %s1671_s30 = sadd.s32 4294967295, %s1986_s29   ;;  %p1675_p0 = scmp.ge.s32.totalorder %s1986_s29, 1  ;;  %s1986_s29 = sphi %s2066_s29, %s24_s29  }
   0x2   : > { %p411_p1 = scmp.lt.s32.totalorder %s1986_s29, 5 }
   0x4   : > { %p412_p2 = pnand %p1675_p0, %p411_p1 }
   0x5   : > { %p455_p3 = scmp.lt.s32.totalorder (!%p412_p2), %s1671_s30, 3 }
   0x6   : > { %415 = sbr.rel (%p412_p2) target bundleno = 1441 (0x5a1), region = 76 }
   0xb   : > { %v464_v0 = vld [vmem:[%s2408_s1] sm:$0xff]  ;;  %vm520_vm0 = vcmask 64512   ;;  %v1988_v1 = vmov 0   ;;  %s2423_s30 = smov (!%p455_p3, %s1671_s30), 3  ;;  %v479_v2 = vld [vmem:[%s2409_s2 + $0x38] sm:$0xff]  ;;  %v477_v3 = vld [vmem:[%s2409_s2 + $0x28] sm:$0xff] }
   0xc   : > { %1778 = vmatprep.mubr.msk.f32.mxu0 %vm520_vm0, %v464_v0  ;;  %1898 = vset.pattern.permute.xlu0 %v1988_v1  ;;  %s1676_s21 = sshll.u32 %s2423_s30, 3  ;;  %v478_v4 = vld [vmem:[%s2409_s2 + $0x30] sm:$0xff]  ;;  %v476_v5 = vld [vmem:[%s2409_s2 + $0x20] sm:$0xff]  ;;  %v465_v7 = vld [vmem:[%s2408_s1 + $0x8] sm:$0xff]  ;;  %vm794_vm1 = vcmask 523264   ;;  %vm1226_vm10 = vcmask 261120  }
   0xd   : > { %1899 = vset.pattern.permute.xlu1 %v1988_v1  ;;  %517 = vperm.xlu0 %1898, %v479_v2   ;;  %s458_s26 = scalar_lea.vmem %s2407_s0, %s1676_s21  ;;  %v466_v8 = vld [vmem:[%s2408_s1 + $0x10] sm:$0xff]  ;;  %v475_v9 = vld [vmem:[%s2409_s2 + $0x18] sm:$0xff]  ;;  %v468_v12 = vld [vmem:[%s2408_s1 + $0x20] sm:$0xff]  ;;  %s1677_s17 = sshll.u32 %s2423_s30, 1 }
   0xe   : > { %507 = vperm.xlu1 %1899, %v477_v3   ;;  %v463_v6 = vld [vmem:[%s458_s26] sm:$0xff]  ;;  %v474_v10 = vld [vmem:[%s2409_s2 + $0x10] sm:$0xff]  ;;  %v467_v11 = vld [vmem:[%s2408_s1 + $0x18] sm:$0xff]  ;;  %s462_s20 = scalar_lea.vmem %s2421_s14, %s1677_s17 }
   0xf   : > { %1776 = vmatprep.subr.mxu0 %v463_v6  ;;  %v473_v13 = vld [vmem:[%s2409_s2 + $0x8] sm:$0xff]  ;;  %v472_v14 = vld [vmem:[%s2409_s2] sm:$0xff]  ;;  %v470_v16 = vld [vmem:[%s2408_s1 + $0x30] sm:$0xff] }
  0x10   : > { %1777 = vmatpush3.msra.mxu0 %v463_v6  ;;  %v469_v15 = vld [vmem:[%s2408_s1 + $0x28] sm:$0xff]  ;;  %v753_v17 = vld [vmem:[%s2411_s4 + $0x38] sm:$0xff]  ;;  %v752_v18 = vld [vmem:[%s2411_s4 + $0x30] sm:$0xff] }
  0x11   : > { %512 = vperm.xlu0 %1898, %v478_v4   ;;  %1779 = vmatmul.mubr.msk.f32.vlgmr.msra.gmra.mxu0 %vm520_vm0, %v465_v7  ;;  %v471_v19 = vld [vmem:[%s2408_s1 + $0x38] sm:$0xff]  ;;  %v751_v20 = vld [vmem:[%s2411_s4 + $0x28] sm:$0xff]  ;;  %v750_v21 = vld [vmem:[%s2411_s4 + $0x20] sm:$0xff] }
  0x12   : > { %502 = vperm.xlu1 %1899, %v476_v5   ;;  %1818 = vmatprep.subr.mxu0 %v463_v6  ;;  %v749_v22 = vld [vmem:[%s2411_s4 + $0x18] sm:$0xff]  ;;  %v748_v23 = vld [vmem:[%s2411_s4 + $0x10] sm:$0xff]  ;;  %v747_v24 = vld [vmem:[%s2411_s4 + $0x8] sm:$0xff] }
  0x13   : > { %1781 = vmatprep.mubr.msk.f32.mxu0 %vm520_vm0, %v466_v8  ;;  %1819 = vmatpush3.msra.mxu0 %v463_v6  ;;  %v746_v25 = vld [vmem:[%s2411_s4] sm:$0xff]  ;;  %v1129_v26 = vld [vmem:[%s2414_s7 + $0x18] sm:$0xff]  ;;  %v1128_v27 = vld [vmem:[%s2414_s7 + $0x10] sm:$0xff] }
  0x14   : > { %v1127_v28 = vld [vmem:[%s2414_s7 + $0x8] sm:$0xff]  ;;  %v1126_v29 = vld [vmem:[%s2414_s7] sm:$0xff]  ;;  %v1205_v30 = vld [vmem:[%s2416_s9 + $0x18] sm:$0xff] }
  0x15   : > { %497 = vperm.xlu0 %1898, %v475_v9   ;;  %1782 = vmatmul.mubr.msk.f32.gmra.mxu0 %vm520_vm0, %v467_v11  ;;  %v1204_v31 = vld [vmem:[%s2416_s9 + $0x10] sm:$0xff]  ;;  %v1203_v32 = vld [vmem:[%s2416_s9 + $0x8] sm:$0xff]  ;;  %v1202_v33 = vld [vmem:[%s2416_s9] sm:$0xff] }
  0x16   : > { %492 = vperm.xlu1 %1899, %v474_v10   ;;  %1784 = vmatprep.mubr.msk.f32.mxu0 %vm520_vm0, %v468_v12  ;;  %v1375_v34 = vld [vmem:[%s2418_s11 + $0x18] sm:$0xff]  ;;  %v1374_v35 = vld [vmem:[%s2418_s11 + $0x10] sm:$0xff]  ;;  %v1373_v36 = vld [vmem:[%s2418_s11 + $0x8] sm:$0xff] }
  0x17   : > { %v1372_v37 = vld [vmem:[%s2418_s11] sm:$0xff] }
  0x18   : > { %v1538_v38 = vld [vmem:[%s2420_s13] sm:$0x3] }
  0x19   : > { %487 = vperm.xlu0 %1898, %v473_v13   ;;  %1785 = vmatmul.mubr.msk.f32.gmra.mxu0 %vm520_vm0, %v469_v15  ;;  %v738_v39 = vld [vmem:[%s2410_s3] sm:$0xff] }
  0x1a   : > { %482 = vperm.xlu1 %1899, %v472_v14   ;;  %1787 = vmatprep.mubr.msk.f32.mxu0 %vm520_vm0, %v470_v16 }
  0x1b   : > { %1806 = vmatprep.mubr.msk.f32.mxu1 %vm794_vm1, %v738_v39 }
  0x1d   : > { %791 = vperm.xlu0 %1898, %v753_v17   ;;  %1788 = vmatmul.mubr.msk.f32.gmra.mxu0 %vm520_vm0, %v471_v19 }
  0x1e   : > { %786 = vperm.xlu1 %1899, %v752_v18  }
  0x21   : > { %781 = vperm.xlu0 %1898, %v751_v20  }
  0x22   : > { %776 = vperm.xlu1 %1899, %v750_v21  }
  0x25   : > { %771 = vperm.xlu0 %1898, %v749_v22  }
  0x26   : > { %766 = vperm.xlu1 %1899, %v748_v23  }
  0x29   : > { %761 = vperm.xlu0 %1898, %v747_v24  }
  0x2a   : > { %756 = vperm.xlu1 %1899, %v746_v25  }
  0x2d   : > { %1147 = vperm.xlu0 %1898, %v1129_v26  }
  0x2e   : > { %1142 = vperm.xlu1 %1899, %v1128_v27  }
  0x31   : > { %1137 = vperm.xlu0 %1898, %v1127_v28  }
  0x32   : > { %1132 = vperm.xlu1 %1899, %v1126_v29  }
  0x35   : > { %1223 = vperm.xlu0 %1898, %v1205_v30  }
  0x36   : > { %1218 = vperm.xlu1 %1899, %v1204_v31  }
  0x39   : > { %1213 = vperm.xlu0 %1898, %v1203_v32  }
  0x3a   : > { %1208 = vperm.xlu1 %1899, %v1202_v33  }
  0x3d   : > { %1393 = vperm.xlu0 %1898, %v1375_v34  }
  0x3e   : > { %1388 = vperm.xlu1 %1899, %v1374_v35  }
  0x41   : > { %1383 = vperm.xlu0 %1898, %v1373_v36  }
  0x42   : > { %1378 = vperm.xlu1 %1899, %v1372_v37  }
  0x45   : > { %1541 = vperm.xlu0 %1898, %v1538_v38  }
  0x88   : > { %v518_v40 = vpop.permute.xlu0 %517 }
  0x89   : > { %v508_v41 = vpop.permute.xlu1 %507 }
  0x8c   : > { %v513_v42 = vpop.permute.xlu0 %512 }
  0x8d   : > { %v503_v43 = vpop.permute.xlu1 %502 }
  0x90   : > { %v498_v44 = vpop.permute.xlu0 %497 }
  0x91   : > { %v493_v46 = vpop.permute.xlu1 %492 }
  0x94   : > { %v488_v48 = vpop.permute.xlu0 %487 }
  0x95   : > { %v483_v53 = vpop.permute.xlu1 %482 }
  0xd1   : > { %v1780_v45 = vpop.f32.mrf.mxu0 }
  0xd2   : > { %v2203_v49 = vadd.f32 %v1780_v45, %v488_v48 }
  0xd3   : > { %v611_v47 = vpop.f32.mrf.mxu0 }
  0xd4   : > { %v659_v56 = vsub.f32 0.0, %v2203_v49  ;;  %v2212_v57 = vadd.f32 %v611_v47, %v483_v53  ;;  %vm651_vm3 = vcmp.ge.f32.partialorder %v2203_v49, 0.0 }
  0xd5   : > { %v1783_v50 = vpop.f32.mrf.mxu0 }
  0xd6   : > { %v2205_v51 = vadd.f32 %v1783_v50, %v498_v44  ;;  %v658_v2 = vsub.f32 0.0, %v2212_v57  ;;  %v667_v5 = vsel %vm651_vm3, %v659_v56, %v2203_v49  ;;  %vm650_vm6 = vcmp.ge.f32.partialorder %v2212_v57, 0.0 }
  0xd7   : > { %v621_v52 = vpop.f32.mrf.mxu0  ;;  %v676_v16 = vmul.f32 1.442695, %v667_v5 }
  0xd8   : > { %v661_v54 = vsub.f32 0.0, %v2205_v51  ;;  %v2208_v55 = vadd.f32 %v621_v52, %v493_v46  ;;  %vm653_vm2 = vcmp.ge.f32.partialorder %v2205_v51, 0.0  ;;  %v666_v17 = vsel %vm650_vm6, %v658_v2, %v2212_v57 }
  0xd9   : > { %v1786_v58 = vpop.f32.mrf.mxu0  ;;  %v674_v23 = vmul.f32 1.442695, %v666_v17  ;;  %v924_v17 = vld [vmem:[%s2413_s6] sm:$0xff] }
  0xda   : > { %v660_v59 = vsub.f32 0.0, %v2208_v55  ;;  %v2216_v60 = vadd.f32 %v1786_v58, %v508_v41  ;;  %v669_v61 = vsel %vm653_vm2, %v661_v54, %v2205_v51  ;;  %vm652_vm4 = vcmp.ge.f32.partialorder %v2208_v55, 0.0 }
  0xdb   : > { %v631_v62 = vpop.f32.mrf.mxu0  ;;  %v680_v4 = vmul.f32 1.442695, %v669_v61 }
  0xdc   : > { %v663_v63 = vsub.f32 0.0, %v2216_v60  ;;  %v2223_v0 = vadd.f32 %v631_v62, %v503_v43  ;;  %vm655_vm5 = vcmp.ge.f32.partialorder %v2216_v60, 0.0  ;;  %v668_v1 = vsel %vm652_vm4, %v660_v59, %v2208_v55 }
  0xdd   : > { %v1789_v3 = vpop.f32.mrf.mxu0  ;;  %v678_v11 = vmul.f32 1.442695, %v668_v1 }
  0xde   : > { %v662_v6 = vsub.f32 0.0, %v2223_v0  ;;  %v2235_v7 = vadd.f32 %v1789_v3, %v518_v40  ;;  %v671_v8 = vsel %vm655_vm5, %v663_v63, %v2216_v60  ;;  %vm654_vm7 = vcmp.ge.f32.partialorder %v2223_v0, 0.0 }
  0xdf   : > { %v641_v9 = vpop.f32.mrf.mxu0  ;;  %v684_v10 = vmul.f32 1.442695, %v671_v8 }
  0xe0   : > { %v665_v12 = vsub.f32 0.0, %v2235_v7  ;;  %v642_v13 = vadd.f32 %v641_v9, %v513_v42  ;;  %vm657_vm8 = vcmp.ge.f32.partialorder %v2235_v7, 0.0  ;;  %v670_v14 = vsel %vm654_vm7, %v662_v6, %v2223_v0 }
  0xe1   : > { %1900 = vpow2.f32 %v684_v10  ;;  %v682_v15 = vmul.f32 1.442695, %v670_v14  ;;  %v745_v14 = vld [vmem:[%s2410_s3 + $0x38] sm:$0xff] }
  0xe2   : > { %v664_v18 = vsub.f32 0.0, %v642_v13  ;;  %v673_v19 = vsel %vm657_vm8, %v665_v12, %v2235_v7  ;;  %vm656_vm9 = vcmp.ge.f32.partialorder %v642_v13, 0.0  ;;  %1902 = vpow2.f32 %v680_v4  ;;  %v743_v12 = vld [vmem:[%s2410_s3 + $0x28] sm:$0xff] }
  0xe3   : > { %v688_v20 = vmul.f32 1.442695, %v673_v19  ;;  %1904 = vpow2.f32 %v682_v15  ;;  %v928_v15 = vld [vmem:[%s2412_s5] sm:$0xff]  ;;  %v931_v19 = vld [vmem:[%s2412_s5 + $0x18] sm:$0xff] }
  0xe4   : > { %v672_v21 = vsel %vm656_vm9, %v664_v18, %v642_v13  ;;  %1906 = vpow2.f32 %v678_v11  ;;  %1820 = vmatprep.mubr.msk.f32.mxu0 %vm520_vm0, %v928_v15  ;;  %v930_v18 = vld [vmem:[%s2412_s5 + $0x10] sm:$0xff] }
  0xe5   : > { %1908 = vpow2.f32 %v688_v20  ;;  %v686_v22 = vmul.f32 1.442695, %v672_v21 }
  0xe6   : > { %1910 = vpow2.f32 %v676_v16  ;;  %v929_v16 = vld [vmem:[%s2412_s5 + $0x8] sm:$0xff] }
  0xe7   : > { %1912 = vpow2.f32 %v686_v22  ;;  %1821 = vmatmul.mubr.msk.f32.vlgmr.msra.gmra.mxu0 %vm520_vm0, %v929_v16 }
  0xe8   : > { %1914 = vpow2.f32 %v674_v23  ;;  %1823 = vmatprep.mubr.msk.f32.mxu0 %vm520_vm0, %v930_v18  ;;  %v792_v23 = vpop.permute.xlu0 %791 }
  0xeb   : > { %1824 = vmatmul.mubr.msk.f32.gmra.mxu0 %vm520_vm0, %v931_v19 }
  0xee   : > { %v1901_v24 = vpop.eup %1900 }
  0xef   : > { %v1903_v25 = vpop.eup %1902  ;;  %v695_v26 = vadd.f32 1.0, %v1901_v24 }
  0xf0   : > { %v1905_v27 = vpop.eup %1904  ;;  %v693_v31 = vadd.f32 1.0, %v1903_v25 }
  0xf1   : > { %v1907_v28 = vpop.eup %1906  ;;  %v694_v29 = vadd.f32 1.0, %v1905_v27  ;;  %1916 = vrcp.f32 %v695_v26 }
  0xf2   : > { %v1909_v30 = vpop.eup %1908  ;;  %v692_v36 = vadd.f32 1.0, %v1907_v28 }
  0xf3   : > { %v1911_v32 = vpop.eup %1910  ;;  %v697_v33 = vadd.f32 1.0, %v1909_v30  ;;  %1918 = vrcp.f32 %v694_v29 }
  0xf4   : > { %v1913_v34 = vpop.eup %1912  ;;  %v691_v38 = vadd.f32 1.0, %v1911_v32 }
  0xf5   : > { %1920 = vrcp.f32 %v697_v33  ;;  %v696_v35 = vadd.f32 1.0, %v1913_v34  ;;  %v1915_v37 = vpop.eup %1914 }
  0xf6   : > { %1922 = vrcp.f32 %v693_v31  ;;  %v690_v39 = vadd.f32 1.0, %v1915_v37 }
  0xf7   : > { %1924 = vrcp.f32 %v696_v35 }
  0xf8   : > { %1926 = vrcp.f32 %v692_v36 }
  0xf9   : > { %1928 = vrcp.f32 %v691_v38 }
  0xfa   : > { %1930 = vrcp.f32 %v690_v39 }
  0xfe   : > { %v1917_v40 = vpop.eup %1916 }
  0xff   : > { %v719_v45 = vmul.f32 %v1917_v40, %v1901_v24 }
 0x100   : > { %v1919_v41 = vpop.eup %1918 }
 0x101   : > { %v718_v50 = vmul.f32 %v1919_v41, %v1905_v27  ;;  %v727_v56 = vsel %vm655_vm5, %v1917_v40, %v719_v45  ;;  %v926_v45 = vld [vmem:[%s2413_s6 + $0x10] sm:$0xff] }
 0x102   : > { %v1921_v42 = vpop.eup %1920  ;;  %v735_v2 = vmul.f32 %v727_v56, %v2216_v60 }
 0x103   : > { %v1923_v43 = vpop.eup %1922  ;;  %v721_v44 = vmul.f32 %v1921_v42, %v1909_v30  ;;  %v726_v62 = vsel %vm654_vm7, %v1919_v41, %v718_v50 }
 0x104   : > { %v1925_v46 = vpop.eup %1924  ;;  %v717_v58 = vmul.f32 %v1923_v43, %v1903_v25  ;;  %v734_v5 = vmul.f32 %v726_v62, %v2223_v0  ;;  %v787_v25 = vpop.permute.xlu1 %786 }
 0x105   : > { %v729_v47 = vsel %vm657_vm8, %v1921_v42, %v721_v44  ;;  %v720_v48 = vmul.f32 %v1925_v46, %v1913_v34  ;;  %v1927_v52 = vpop.eup %1926  ;;  %v925_v44 = vld [vmem:[%s2413_s6 + $0x8] sm:$0xff] }
 0x106   : > { %v737_v53 = vmul.f32 %v729_v47, %v2235_v7  ;;  %v1929_v59 = vpop.eup %1928  ;;  %v716_v63 = vmul.f32 %v1927_v52, %v1907_v28  ;;  %v725_v3 = vsel %vm653_vm2, %v1923_v43, %v717_v58  ;;  %v782_v28 = vpop.permute.xlu0 %781  ;;  %v1198_v47 = vld [vmem:[%s2415_s8] sm:$0xff] }
 0x107   : > { %v728_v54 = vsel %vm656_vm9, %v1925_v46, %v720_v48  ;;  %v1931_v1 = vpop.eup %1930  ;;  %v715_v4 = vmul.f32 %v1929_v59, %v1911_v32  ;;  %v733_v8 = vmul.f32 %v725_v3, %v2205_v51  ;;  %v739_v51 = vld [vmem:[%s2410_s3 + $0x8] sm:$0xff]  ;;  %v927_v46 = vld [vmem:[%s2413_s6 + $0x18] sm:$0xff]  ;;  %1856 = vmatprep.mubr.msk.f32.mxu0 %vm1226_vm10, %v1198_v47 }
 0x108   : > { %1790 = vmatprep.subr.mxu1 %v737_v53  ;;  %v736_v61 = vmul.f32 %v728_v54, %v642_v13  ;;  %v724_v6 = vsel %vm652_vm4, %v1927_v52, %v716_v63  ;;  %v714_v7 = vmul.f32 %v1931_v1, %v1915_v37  ;;  %v744_v13 = vld [vmem:[%s2410_s3 + $0x30] sm:$0xff]  ;;  %v777_v31 = vpop.permute.xlu1 %776 }
 0x109   : > { %1791 = vmatpush3.msra.mxu1 %v737_v53  ;;  %v723_v60 = vsel %vm651_vm3, %v1929_v59, %v715_v4  ;;  %v732_v9 = vmul.f32 %v724_v6, %v2208_v55  ;;  %v740_v55 = vld [vmem:[%s2410_s3 + $0x10] sm:$0xff]  ;;  %vm1990_vm3 = vmmov 0  }
 0x10a   : > { %1792 = vmatprep.subr.mxu1 %v736_v61  ;;  %v722_v10 = vsel %vm650_vm6, %v1931_v1, %v714_v7  ;;  %v731_v0 = vmul.f32 %v723_v60, %v2203_v49  ;;  %v741_v49 = vld [vmem:[%s2410_s3 + $0x18] sm:$0xff]  ;;  %v772_v35 = vpop.permute.xlu0 %771 }
 0x10b   : > { %1793 = vmatpush3.msra.mxu1 %v736_v61  ;;  %v730_v11 = vmul.f32 %v722_v10, %v2212_v57  ;;  %v742_v57 = vld [vmem:[%s2410_s3 + $0x20] sm:$0xff] }
 0x10c   : > { %1794 = vmatprep.subr.mxu1 %v735_v2  ;;  %v767_v37 = vpop.permute.xlu1 %766 }
 0x10d   : > { %1795 = vmatpush3.msra.mxu1 %v735_v2 }
 0x10e   : > { %1796 = vmatprep.subr.mxu1 %v734_v5  ;;  %v762_v40 = vpop.permute.xlu0 %761 }
 0x10f   : > { %1797 = vmatpush3.msra.mxu1 %v734_v5 }
 0x110   : > { %1798 = vmatprep.subr.mxu1 %v733_v8  ;;  %v757_v42 = vpop.permute.xlu1 %756 }
 0x111   : > { %1799 = vmatpush3.msra.mxu1 %v733_v8 }
 0x112   : > { %1800 = vmatprep.subr.mxu1 %v732_v9  ;;  %v1148_v50 = vpop.permute.xlu0 %1147 }
 0x113   : > { %1801 = vmatpush3.msra.mxu1 %v732_v9 }
 0x114   : > { %1802 = vmatprep.subr.mxu1 %v731_v0  ;;  %v1143_v52 = vpop.permute.xlu1 %1142 }
 0x115   : > { %1803 = vmatpush3.msra.mxu1 %v731_v0 }
 0x116   : > { %1804 = vmatprep.subr.mxu1 %v730_v11  ;;  %v1138_v56 = vpop.permute.xlu0 %1137 }
 0x117   : > { %1805 = vmatpush3.msra.mxu1 %v730_v11 }
 0x118   : > { %1807 = vmatmul.mubr.msk.f32.vlgmr.msra.gmra.mxu1 %vm794_vm1, %v739_v51  ;;  %v1133_v1 = vpop.permute.xlu1 %1132 }
 0x119   : > { %1809 = vmatprep.mubr.msk.f32.mxu1 %vm794_vm1, %v740_v55 }
 0x11c   : > { %1810 = vmatmul.mubr.msk.f32.gmra.mxu1 %vm794_vm1, %v741_v49 }
 0x11d   : > { %1812 = vmatprep.mubr.msk.f32.mxu1 %vm794_vm1, %v742_v57 }
 0x120   : > { %1813 = vmatmul.mubr.msk.f32.gmra.mxu1 %vm794_vm1, %v743_v12 }
 0x121   : > { %1815 = vmatprep.mubr.msk.f32.mxu1 %vm794_vm1, %v744_v13 }
 0x124   : > { %1816 = vmatmul.mubr.msk.f32.gmra.mxu1 %vm794_vm1, %v745_v14 }
 0x125   : > { %1842 = vmatprep.mubr.msk.f32.mxu1 %vm794_vm1, %v924_v17 }
 0x1a7   : > { %v1822_v48 = vpop.f32.mrf.mxu0 }
 0x1a9   : > { %v1010_v53 = vpop.f32.mrf.mxu0 }
 0x1ab   : > { %v1825_v59 = vpop.f32.mrf.mxu0 }
 0x1ad   : > { %v1020_v6 = vpop.f32.mrf.mxu0 }
 0x1d8   : > { %v1808_v20 = vpop.f32.mrf.mxu1 }
 0x1d9   : > { %v891_v41 = vadd.f32 %v1808_v20, %v762_v40  ;;  %v1199_v40 = vld [vmem:[%s2415_s8 + $0x8] sm:$0xff] }
 0x1da   : > { %v885_v21 = vpop.f32.mrf.mxu1 }
 0x1db   : > { %v886_v43 = vadd.f32 %v885_v21, %v757_v42  ;;  %v1201_v42 = vld [vmem:[%s2415_s8 + $0x18] sm:$0xff] }
 0x1dc   : > { %v1811_v22 = vpop.f32.mrf.mxu1 }
 0x1dd   : > { %v901_v38 = vadd.f32 %v1811_v22, %v772_v35 }
 0x1de   : > { %v895_v24 = vpop.f32.mrf.mxu1 }
 0x1df   : > { %v896_v39 = vadd.f32 %v895_v24, %v767_v37 }
 0x1e0   : > { %v1814_v26 = vpop.f32.mrf.mxu1 }
 0x1e1   : > { %v911_v34 = vadd.f32 %v1814_v26, %v782_v28 }
 0x1e2   : > { %v905_v27 = vpop.f32.mrf.mxu1 }
 0x1e3   : > { %v906_v36 = vadd.f32 %v905_v27, %v777_v31 }
 0x1e4   : > { %v1817_v29 = vpop.f32.mrf.mxu1 }
 0x1e5   : > { %v921_v30 = vadd.f32 %v1817_v29, %v792_v23 }
 0x1e6   : > { %v915_v32 = vpop.f32.mrf.mxu1 }
 0x1e7   : > { %v916_v33 = vadd.f32 %v915_v32, %v787_v25  ;;  %1826 = vmatprep.subr.mxu1 %v921_v30 }
 0x1e8   : > { %1827 = vmatpush3.msra.mxu1 %v921_v30 }
 0x1e9   : > { %1828 = vmatprep.subr.mxu1 %v916_v33 }
 0x1ea   : > { %1829 = vmatpush3.msra.mxu1 %v916_v33 }
 0x1eb   : > { %1830 = vmatprep.subr.mxu1 %v911_v34 }
 0x1ec   : > { %1831 = vmatpush3.msra.mxu1 %v911_v34 }
 0x1ed   : > { %1832 = vmatprep.subr.mxu1 %v906_v36 }
 0x1ee   : > { %1833 = vmatpush3.msra.mxu1 %v906_v36 }
 0x1ef   : > { %1834 = vmatprep.subr.mxu1 %v901_v38 }
 0x1f0   : > { %1835 = vmatpush3.msra.mxu1 %v901_v38 }
 0x1f1   : > { %1836 = vmatprep.subr.mxu1 %v896_v39 }
 0x1f2   : > { %1837 = vmatpush3.msra.mxu1 %v896_v39 }
 0x1f3   : > { %1838 = vmatprep.subr.mxu1 %v891_v41 }
 0x1f4   : > { %1839 = vmatpush3.msra.mxu1 %v891_v41  ;;  %v1200_v41 = vld [vmem:[%s2415_s8 + $0x10] sm:$0xff] }
 0x1f5   : > { %1840 = vmatprep.subr.mxu1 %v886_v43 }
 0x1f6   : > { %1841 = vmatpush3.msra.mxu1 %v886_v43  ;;  %v1368_v43 = vld [vmem:[%s2417_s10] sm:$0xff] }
 0x1f7   : > { %1843 = vmatmul.mubr.msk.f32.vlgmr.msra.gmra.mxu1 %vm794_vm1, %v925_v44  ;;  %v1224_v44 = vpop.permute.xlu0 %1223 }
 0x1f8   : > { %1845 = vmatprep.mubr.msk.f32.mxu1 %vm794_vm1, %v926_v45  ;;  %v1219_v45 = vpop.permute.xlu1 %1218 }
 0x1fb   : > { %1846 = vmatmul.mubr.msk.f32.gmra.mxu1 %vm794_vm1, %v927_v46  ;;  %v1214_v46 = vpop.permute.xlu0 %1213 }
 0x2b7   : > { %v1844_v54 = vpop.f32.mrf.mxu1 }
 0x2b8   : > { %v1113_v58 = vadd.f32 %v1844_v54, %v1822_v48 }
 0x2b9   : > { %v1107_v61 = vpop.f32.mrf.mxu1 }
 0x2ba   : > { %v1151_v62 = vadd.f32 %v1138_v56, %v1113_v58  ;;  %v1108_v63 = vadd.f32 %v1107_v61, %v1010_v53 }
 0x2bb   : > { %v1847_v2 = vpop.f32.mrf.mxu1 }
 0x2bc   : > { %v1159_v3 = vsub.f32 0.0, %v1151_v62  ;;  %v1150_v4 = vadd.f32 %v1133_v1, %v1108_v63  ;;  %v1123_v5 = vadd.f32 %v1847_v2, %v1825_v59  ;;  %vm1155_vm11 = vcmp.ge.f32.partialorder %v1151_v62, 0.0 }
 0x2bd   : > { %v1117_v7 = vpop.f32.mrf.mxu1 }
 0x2be   : > { %v1158_v8 = vsub.f32 0.0, %v1150_v4  ;;  %v1153_v60 = vadd.f32 %v1148_v50, %v1123_v5  ;;  %v1118_v9 = vadd.f32 %v1117_v7, %v1020_v6  ;;  %v1163_v10 = vsel %vm1155_vm11, %v1159_v3, %v1151_v62  ;;  %v1209_v50 = vpop.permute.xlu1 %1208 }
 0x2bf   : > { %v1168_v0 = vmul.f32 1.442695, %v1163_v10  ;;  %vm1154_vm12 = vcmp.ge.f32.partialorder %v1150_v4, 0.0 }
 0x2c0   : > { %v1161_v11 = vsub.f32 0.0, %v1153_v60  ;;  %v1152_v51 = vadd.f32 %v1143_v52, %v1118_v9  ;;  %vm1157_vm13 = vcmp.ge.f32.partialorder %v1153_v60, 0.0  ;;  %v1162_v55 = vsel %vm1154_vm12, %v1158_v8, %v1150_v4 }
 0x2c1   : > { %1932 = vpow2.f32 %v1168_v0  ;;  %v1166_v49 = vmul.f32 1.442695, %v1162_v55 }
 0x2c2   : > { %v1160_v57 = vsub.f32 0.0, %v1152_v51  ;;  %v1165_v12 = vsel %vm1157_vm13, %v1161_v11, %v1153_v60  ;;  %vm1156_vm14 = vcmp.ge.f32.partialorder %v1152_v51, 0.0 }
 0x2c3   : > { %v1172_v13 = vmul.f32 1.442695, %v1165_v12  ;;  %1934 = vpow2.f32 %v1166_v49 }
 0x2c4   : > { %v1164_v14 = vsel %vm1156_vm14, %v1160_v57, %v1152_v51 }
 0x2c5   : > { %1936 = vpow2.f32 %v1172_v13  ;;  %v1170_v15 = vmul.f32 1.442695, %v1164_v14 }
 0x2c7   : > { %1938 = vpow2.f32 %v1170_v15 }
 0x2ce   : > { %v1933_v16 = vpop.eup %1932 }
 0x2cf   : > { %v1175_v17 = vadd.f32 1.0, %v1933_v16 }
 0x2d0   : > { %v1935_v18 = vpop.eup %1934 }
 0x2d1   : > { %v1174_v19 = vadd.f32 1.0, %v1935_v18  ;;  %1940 = vrcp.f32 %v1175_v17 }
 0x2d2   : > { %v1937_v20 = vpop.eup %1936 }
 0x2d3   : > { %v1177_v21 = vadd.f32 1.0, %v1937_v20  ;;  %1942 = vrcp.f32 %v1174_v19 }
 0x2d4   : > { %v1939_v22 = vpop.eup %1938 }
 0x2d5   : > { %1944 = vrcp.f32 %v1177_v21  ;;  %v1176_v23 = vadd.f32 1.0, %v1939_v22 }
 0x2d7   : > { %1946 = vrcp.f32 %v1176_v23 }
 0x2de   : > { %v1941_v24 = vpop.eup %1940 }
 0x2df   : > { %v1187_v28 = vmul.f32 %v1941_v24, %v1933_v16 }
 0x2e0   : > { %v1943_v25 = vpop.eup %1942 }
 0x2e1   : > { %v1186_v32 = vmul.f32 %v1943_v25, %v1935_v18  ;;  %v1191_v35 = vsel %vm1155_vm11, %v1941_v24, %v1187_v28  ;;  %v1369_v28 = vld [vmem:[%s2417_s10 + $0x8] sm:$0xff] }
 0x2e2   : > { %v1945_v26 = vpop.eup %1944  ;;  %v1195_v38 = vmul.f32 %v1191_v35, %v1151_v62 }
 0x2e3   : > { %v1189_v27 = vmul.f32 %v1945_v26, %v1937_v20  ;;  %v1190_v37 = vsel %vm1154_vm12, %v1943_v25, %v1186_v32  ;;  %v1394_v32 = vpop.permute.xlu0 %1393 }
 0x2e4   : > { %v1947_v29 = vpop.eup %1946  ;;  %v1194_v39 = vmul.f32 %v1190_v37, %v1150_v4 }
 0x2e5   : > { %v1193_v30 = vsel %vm1157_vm13, %v1945_v26, %v1189_v27  ;;  %v1188_v31 = vmul.f32 %v1947_v29, %v1939_v22 }
 0x2e6   : > { %v1197_v33 = vmul.f32 %v1193_v30, %v1153_v60  ;;  %v1371_v30 = vld [vmem:[%s2417_s10 + $0x18] sm:$0xff] }
 0x2e7   : > { %v1192_v34 = vsel %vm1156_vm14, %v1947_v29, %v1188_v31  ;;  %v1370_v29 = vld [vmem:[%s2417_s10 + $0x10] sm:$0xff]  ;;  %v1989_v31 = vmov 0.0  }
 0x2e8   : > { %1848 = vmatprep.subr.mxu0 %v1197_v33  ;;  %v1196_v36 = vmul.f32 %v1192_v34, %v1152_v51  ;;  %1876 = vmatprep.subr.mxu1 %v1989_v31  ;;  %v1384_v34 = vpop.permute.xlu0 %1383 }
 0x2e9   : > { %1849 = vmatpush3.msra.mxu0 %v1197_v33  ;;  %1884 = vmatprep.mubr.msk.f32.mxu1 %vm1990_vm3, %v1989_v31  ;;  %v1389_v33 = vpop.permute.xlu1 %1388 }
 0x2ea   : > { %1850 = vmatprep.subr.mxu0 %v1196_v36 }
 0x2eb   : > { %1851 = vmatpush3.msra.mxu0 %v1196_v36 }
 0x2ec   : > { %1852 = vmatprep.subr.mxu0 %v1195_v38 }
 0x2ed   : > { %1853 = vmatpush3.msra.mxu0 %v1195_v38  ;;  %v1379_v37 = vpop.permute.xlu1 %1378 }
 0x2ee   : > { %1854 = vmatprep.subr.mxu0 %v1194_v39 }
 0x2ef   : > { %1855 = vmatpush3.msra.mxu0 %v1194_v39 }
 0x2f0   : > { %1857 = vmatmul.mubr.msk.f32.vlgmr.msra.gmra.mxu0 %vm1226_vm10, %v1199_v40 }
 0x2f1   : > { %1859 = vmatprep.mubr.msk.f32.mxu0 %vm1226_vm10, %v1200_v41 }
 0x2f4   : > { %1860 = vmatmul.mubr.msk.f32.gmra.mxu0 %vm1226_vm10, %v1201_v42 }
 0x2f5   : > { %1870 = vmatprep.mubr.msk.f32.mxu0 %vm1226_vm10, %v1368_v43 }
 0x3b0   : > { %v1858_v47 = vpop.f32.mrf.mxu0 }
 0x3b1   : > { %v1311_v48 = vadd.f32 %v1858_v47, %v1214_v46 }
 0x3b2   : > { %v1305_v52 = vpop.f32.mrf.mxu0 }
 0x3b3   : > { %v1329_v53 = vsub.f32 0.0, %v1311_v48  ;;  %v1306_v54 = vadd.f32 %v1305_v52, %v1209_v50  ;;  %vm1325_vm15 = vcmp.ge.f32.partialorder %v1311_v48, 0.0 }
 0x3b4   : > { %v1861_v56 = vpop.f32.mrf.mxu0 }
 0x3b5   : > { %v1328_v58 = vsub.f32 0.0, %v1306_v54  ;;  %v1321_v59 = vadd.f32 %v1861_v56, %v1224_v44  ;;  %v1333_v61 = vsel %vm1325_vm15, %v1329_v53, %v1311_v48  ;;  %vm1324_vm0 = vcmp.ge.f32.partialorder %v1306_v54, 0.0 }
 0x3b6   : > { %v1315_v62 = vpop.f32.mrf.mxu0  ;;  %v1338_v63 = vmul.f32 1.442695, %v1333_v61 }
 0x3b7   : > { %v1331_v1 = vsub.f32 0.0, %v1321_v59  ;;  %v1316_v2 = vadd.f32 %v1315_v62, %v1219_v45  ;;  %vm1327_vm1 = vcmp.ge.f32.partialorder %v1321_v59, 0.0  ;;  %v1332_v3 = vsel %vm1324_vm0, %v1328_v58, %v1306_v54 }
 0x3b8   : > { %1948 = vpow2.f32 %v1338_v63  ;;  %v1336_v4 = vmul.f32 1.442695, %v1332_v3 }
 0x3b9   : > { %v1330_v5 = vsub.f32 0.0, %v1316_v2  ;;  %v1335_v6 = vsel %vm1327_vm1, %v1331_v1, %v1321_v59  ;;  %vm1326_vm2 = vcmp.ge.f32.partialorder %v1316_v2, 0.0 }
 0x3ba   : > { %v1342_v7 = vmul.f32 1.442695, %v1335_v6  ;;  %1950 = vpow2.f32 %v1336_v4 }
 0x3bb   : > { %v1334_v8 = vsel %vm1326_vm2, %v1330_v5, %v1316_v2 }
 0x3bc   : > { %1952 = vpow2.f32 %v1342_v7  ;;  %v1340_v60 = vmul.f32 1.442695, %v1334_v8 }
 0x3be   : > { %1954 = vpow2.f32 %v1340_v60 }
 0x3c5   : > { %v1949_v9 = vpop.eup %1948 }
 0x3c6   : > { %v1345_v10 = vadd.f32 1.0, %v1949_v9 }
 0x3c7   : > { %v1951_v0 = vpop.eup %1950 }
 0x3c8   : > { %v1344_v11 = vadd.f32 1.0, %v1951_v0  ;;  %1956 = vrcp.f32 %v1345_v10 }
 0x3c9   : > { %v1953_v51 = vpop.eup %1952 }
 0x3ca   : > { %v1347_v55 = vadd.f32 1.0, %v1953_v51  ;;  %1958 = vrcp.f32 %v1344_v11 }
 0x3cb   : > { %v1955_v49 = vpop.eup %1954 }
 0x3cc   : > { %1960 = vrcp.f32 %v1347_v55  ;;  %v1346_v57 = vadd.f32 1.0, %v1955_v49 }
 0x3ce   : > { %1962 = vrcp.f32 %v1346_v57 }
 0x3d5   : > { %v1957_v12 = vpop.eup %1956 }
 0x3d6   : > { %v1357_v16 = vmul.f32 %v1957_v12, %v1949_v9 }
 0x3d7   : > { %v1959_v13 = vpop.eup %1958 }
 0x3d8   : > { %v1356_v20 = vmul.f32 %v1959_v13, %v1951_v0  ;;  %v1361_v23 = vsel %vm1325_vm15, %v1957_v12, %v1357_v16  ;;  %v1537_v16 = vld [vmem:[%s2419_s12] sm:$0x3] }
 0x3d9   : > { %v1961_v14 = vpop.eup %1960  ;;  %v1365_v26 = vmul.f32 %v1361_v23, %v1311_v48 }
 0x3da   : > { %v1359_v15 = vmul.f32 %v1961_v14, %v1953_v51  ;;  %v1360_v25 = vsel %vm1324_vm0, %v1959_v13, %v1356_v20 }
 0x3db   : > { %v1963_v17 = vpop.eup %1962  ;;  %v1364_v27 = vmul.f32 %v1360_v25, %v1306_v54 }
 0x3dc   : > { %v1363_v18 = vsel %vm1327_vm1, %v1961_v14, %v1359_v15  ;;  %v1358_v19 = vmul.f32 %v1963_v17, %v1955_v49 }
 0x3dd   : > { %v1367_v21 = vmul.f32 %v1363_v18, %v1321_v59 }
 0x3de   : > { %v1362_v22 = vsel %vm1326_vm2, %v1963_v17, %v1358_v19  ;;  %v1542_v17 = vpop.permute.xlu0 %1541 }
 0x3df   : > { %1862 = vmatprep.subr.mxu0 %v1367_v21  ;;  %v1366_v24 = vmul.f32 %v1362_v22, %v1316_v2 }
 0x3e0   : > { %1863 = vmatpush3.msra.mxu0 %v1367_v21 }
 0x3e1   : > { %1864 = vmatprep.subr.mxu0 %v1366_v24 }
 0x3e2   : > { %1865 = vmatpush3.msra.mxu0 %v1366_v24 }
 0x3e3   : > { %1866 = vmatprep.subr.mxu0 %v1365_v26 }
 0x3e4   : > { %1867 = vmatpush3.msra.mxu0 %v1365_v26 }
 0x3e5   : > { %1868 = vmatprep.subr.mxu0 %v1364_v27 }
 0x3e6   : > { %1869 = vmatpush3.msra.mxu0 %v1364_v27 }
 0x3e7   : > { %1871 = vmatmul.mubr.msk.f32.vlgmr.msra.gmra.mxu0 %vm1226_vm10, %v1369_v28 }
 0x3e8   : > { %1873 = vmatprep.mubr.msk.f32.mxu0 %vm1226_vm10, %v1370_v29 }
 0x3eb   : > { %1874 = vmatmul.mubr.msk.f32.gmra.mxu0 %vm1226_vm10, %v1371_v30 }
 0x4a7   : > { %v1872_v35 = vpop.f32.mrf.mxu0 }
 0x4a8   : > { %v1480_v36 = vadd.f32 %v1872_v35, %v1384_v34 }
 0x4a9   : > { %v1474_v38 = vpop.f32.mrf.mxu0 }
 0x4aa   : > { %vm1494_vm4 = vcmp.ge.f32.partialorder %v1480_v36, 0.0  ;;  %v1498_v39 = vsub.f32 0.0, %v1480_v36  ;;  %v1475_v40 = vadd.f32 %v1474_v38, %v1379_v37 }
 0x4ab   : > { %v1875_v41 = vpop.f32.mrf.mxu0 }
 0x4ac   : > { %v1502_v42 = vsel %vm1494_vm4, %v1498_v39, %v1480_v36  ;;  %vm1493_vm5 = vcmp.ge.f32.partialorder %v1475_v40, 0.0  ;;  %v1497_v43 = vsub.f32 0.0, %v1475_v40  ;;  %v1490_v44 = vadd.f32 %v1875_v41, %v1394_v32 }
 0x4ad   : > { %v1507_v45 = vmul.f32 1.442695, %v1502_v42  ;;  %v1484_v46 = vpop.f32.mrf.mxu0 }
 0x4ae   : > { %v1501_v47 = vsel %vm1493_vm5, %v1497_v43, %v1475_v40  ;;  %vm1496_vm6 = vcmp.ge.f32.partialorder %v1490_v44, 0.0  ;;  %v1500_v48 = vsub.f32 0.0, %v1490_v44  ;;  %v1485_v50 = vadd.f32 %v1484_v46, %v1389_v33 }
 0x4af   : > { %1964 = vpow2.f32 %v1507_v45  ;;  %v1505_v52 = vmul.f32 1.442695, %v1501_v47 }
 0x4b0   : > { %v1504_v53 = vsel %vm1496_vm6, %v1500_v48, %v1490_v44  ;;  %vm1495_vm7 = vcmp.ge.f32.partialorder %v1485_v50, 0.0  ;;  %v1499_v54 = vsub.f32 0.0, %v1485_v50 }
 0x4b1   : > { %1966 = vpow2.f32 %v1505_v52  ;;  %v1511_v56 = vmul.f32 1.442695, %v1504_v53 }
 0x4b2   : > { %v1503_v58 = vsel %vm1495_vm7, %v1499_v54, %v1485_v50 }
 0x4b3   : > { %1968 = vpow2.f32 %v1511_v56  ;;  %v1509_v59 = vmul.f32 1.442695, %v1503_v58 }
 0x4b5   : > { %1970 = vpow2.f32 %v1509_v59 }
 0x4bc   : > { %v1965_v61 = vpop.eup %1964 }
 0x4bd   : > { %v1514_v62 = vadd.f32 1.0, %v1965_v61 }
 0x4be   : > { %v1967_v63 = vpop.eup %1966 }
 0x4bf   : > { %v1513_v1 = vadd.f32 1.0, %v1967_v63  ;;  %1972 = vrcp.f32 %v1514_v62 }
 0x4c0   : > { %v1969_v2 = vpop.eup %1968 }
 0x4c1   : > { %v1516_v3 = vadd.f32 1.0, %v1969_v2  ;;  %1974 = vrcp.f32 %v1513_v1 }
 0x4c2   : > { %v1971_v4 = vpop.eup %1970 }
 0x4c3   : > { %1976 = vrcp.f32 %v1516_v3  ;;  %v1515_v5 = vadd.f32 1.0, %v1971_v4 }
 0x4c5   : > { %1978 = vrcp.f32 %v1515_v5 }
 0x4cc   : > { %v1973_v6 = vpop.eup %1972 }
 0x4cd   : > { %v1526_v9 = vmul.f32 %v1973_v6, %v1965_v61 }
 0x4ce   : > { %v1975_v7 = vpop.eup %1974 }
 0x4cf   : > { %v1525_v51 = vmul.f32 %v1975_v7, %v1967_v63  ;;  %v1530_v57 = vsel %vm1494_vm4, %v1973_v6, %v1526_v9 }
 0x4d0   : > { %v1977_v8 = vpop.eup %1976  ;;  %v1534_v14 = vmul.f32 %v1530_v57, %v1480_v36 }
 0x4d1   : > { %v1528_v60 = vmul.f32 %v1977_v8, %v1969_v2  ;;  %v1529_v13 = vsel %vm1493_vm5, %v1975_v7, %v1525_v51 }
 0x4d2   : > { %v1979_v10 = vpop.eup %1978  ;;  %v1533_v15 = vmul.f32 %v1529_v13, %v1475_v40 }
 0x4d3   : > { %v1532_v0 = vsel %vm1496_vm6, %v1977_v8, %v1528_v60  ;;  %v1527_v11 = vmul.f32 %v1979_v10, %v1971_v4 }
 0x4d4   : > { %v1536_v55 = vmul.f32 %v1532_v0, %v1490_v44 }
 0x4d5   : > { %v1531_v49 = vsel %vm1495_vm7, %v1979_v10, %v1527_v11 }
 0x4d6   : > { %1877 = vmatpush3.msra.mxu1 %v1536_v55  ;;  %v1535_v12 = vmul.f32 %v1531_v49, %v1485_v50 }
 0x4d7   : > { %1878 = vmatprep.subr.mxu1 %v1989_v31 }
 0x4d8   : > { %1879 = vmatpush3.msra.mxu1 %v1535_v12 }
 0x4d9   : > { %1880 = vmatprep.subr.mxu1 %v1989_v31 }
 0x4da   : > { %1881 = vmatpush3.msra.mxu1 %v1534_v14 }
 0x4db   : > { %1882 = vmatprep.subr.mxu1 %v1989_v31 }
 0x4dc   : > { %1883 = vmatpush3.msra.mxu1 %v1533_v15 }
 0x4dd   : > { %1885 = vmatmul.mubr.msk.f32.vlgmr.msra.gmra.mxu1 %vm1226_vm10, %v1537_v16 }
 0x59d   : > { %v1613_v18 = vpop.f32.mrf.mxu1 }
 0x59e   : > { %v1614_v19 = vadd.f32 %v1613_v18, %v1542_v17 }
 0x59f   : > { %v1886_v20 = vpop.f32.mrf.mxu1 }
 0x5a0   : > { %1617 = vst [vmem:[%s462_s20] sm:$0x3] %v1614_v19 }
 0x5a1 PF: > { %s24_s29 = sadd.s32 1, %s1986_s29  }
 0x5a2   : > { %p21_p4 = scmp.ge.s32.totalorder %s24_s29, 6  }
 0x5a4   :  { %23 = sbr.rel (!%p21_p4) target bundleno = 1 (0x1), region = 106 }

</bundles_post_ra>
